<compile_context>
chip_gen: v7x
topology: tpu7x:2x2x1
jax: 0.10.0
libtpu: 0.0.40
codegen_flags: <defaults>
</compile_context>

<pallas_src>
import math

import jax
import jax.numpy as jnp
from jax import lax
from jax.experimental import pallas as pl
from jax.experimental.pallas import tpu as pltpu

# ----------------------------- model config ---------------------------------
VOCAB_SIZE = 24
D_MODEL    = 32
N_SEGMENTS = 2
MAXLEN     = 16
N_HEADS    = 2
D_K        = 16
D_V        = 16
D_FF       = 64
N_LAYERS   = 2

BATCH   = 2
SEQ_LEN = 8
N_PRED  = 3

_INV_SQRT_DK = 1.0 / math.sqrt(D_K)   # 0.25, exactly representable
_SQRT_2      = math.sqrt(2.0)


def _gelu(x):
    # exact erf-based gelu, same formula as the PyTorch reference
    return x * 0.5 * (1.0 + lax.erf(x / _SQRT_2))


# ------------------------- Pallas kernels -----------------------------------
def encoder_stack_kernel(mask_ref, x_ref,
                         wqkv_ref, bqkv_ref, wo_ref, bo_ref,
                         ln_g_ref, ln_b_ref, w1_ref, b1_ref, w2_ref, b2_ref,
                         out_ref, act_ref, ctx_ref):
    """Runs ONE encoder layer per grid step over grid=(N_LAYERS,).

    The activation (B*S, D) lives in the VMEM scratch `act_ref` across layer
    iterations; per-layer weights arrive as (1, ...) blocks selected by the
    layer grid index.  Fuses: fused-QKV projection, per-head scaled-dot-
    product attention with the reference's 1e-9 mask fill, output projection,
    residual + LayerNorm, and the position-wise FFN (fc1 -> gelu -> fc2).
    """
    layer = pl.program_id(0)

    # Seed the resident activation with the embedding at the first layer.
    @pl.when(layer == 0)
    def _():
        act_ref[...] = x_ref[...]

    x = act_ref[...]                                    # (B*S, D)

    # pad-key mask, broadcast from (B, S) once (hoisted out of the head loop)
    pad = mask_ref[...]                                 # (B, S), 1.0 == PAD key
    pad_key = jnp.broadcast_to(pad[:, None, :], (BATCH, SEQ_LEN, SEQ_LEN)) > 0.5

    # fused QKV projection: one (16,32)x(32,96) matmul
    qkv = (jnp.dot(x, wqkv_ref[0], preferred_element_type=jnp.float32)
           + bqkv_ref[0])                               # (B*S, 3*H*D_K)

    HD = N_HEADS * D_K
    q = qkv[:, 0 * HD:1 * HD]                           # (B*S, H*D_K)
    k = qkv[:, 1 * HD:2 * HD]
    v = qkv[:, 2 * HD:3 * HD]

    # per-head attention; head contexts written into contiguous VMEM scratch
    for h in range(N_HEADS):
        qh = q[:, h * D_K:(h + 1) * D_K].reshape(BATCH, SEQ_LEN, D_K)
        kh = k[:, h * D_K:(h + 1) * D_K].reshape(BATCH, SEQ_LEN, D_K)
        vh = v[:, h * D_V:(h + 1) * D_V].reshape(BATCH, SEQ_LEN, D_V)

        scores = jnp.einsum('bqd,bkd->bqk', qh, kh,
                            preferred_element_type=jnp.float32) * _INV_SQRT_DK
        # reference quirk: masked_fill_(mask, 1e-9)   (NOT -inf)
        scores = jnp.where(pad_key, jnp.float32(1e-9), scores)

        smax = jnp.max(scores, axis=-1, keepdims=True)
        e = jnp.exp(scores - smax)
        attn = e * pl.reciprocal(jnp.sum(e, axis=-1, keepdims=True), approx=True)

        ctx_h = jnp.einsum('bqk,bkd->bqd', attn, vh,
                           preferred_element_type=jnp.float32)
        ctx_ref[:, h * D_V:(h + 1) * D_V] = ctx_h.reshape(BATCH * SEQ_LEN, D_V)

    context = ctx_ref[...]                              # (B*S, H*D_V)

    attn_out = (jnp.dot(context, wo_ref[0], preferred_element_type=jnp.float32)
                + bo_ref[0])

    # residual + LayerNorm (eps = 1e-5, PyTorch default)
    y = attn_out + x
    mu = jnp.mean(y, axis=-1, keepdims=True)
    var = jnp.mean((y - mu) ** 2, axis=-1, keepdims=True)
    y = (y - mu) * lax.rsqrt(var + 1e-5) * ln_g_ref[0] + ln_b_ref[0]

    # position-wise FFN: fc2(gelu(fc1(y)))   (no residual / LN, per reference)
    hmid = _gelu(jnp.dot(y, w1_ref[0], preferred_element_type=jnp.float32)
                 + b1_ref[0])
    out = (jnp.dot(hmid, w2_ref[0], preferred_element_type=jnp.float32)
           + b2_ref[0])

    act_ref[...] = out        # carry to next layer iteration
    out_ref[...] = out        # final value persists after the last layer


def head_kernel(cls_ref, hm_ref,
                fc_w_ref, fc_b_ref, cls_w_ref, cls_b_ref,
                lin_w_ref, lin_b_ref, emb_ref,
                lm_ref, clsf_ref):
    """Fused BERT head: pooler Linear+tanh, classifier, MLM Linear+gelu and
    tied-embedding projection (contraction on axis 1 of tok_embed, no .T)."""
    # pooler: Linear -> Dropout(identity) -> Tanh on [CLS]
    h_pooled = jnp.tanh(
        jnp.dot(cls_ref[...], fc_w_ref[...],
                preferred_element_type=jnp.float32) + fc_b_ref[...])
    clsf_ref[...] = (jnp.dot(h_pooled, cls_w_ref[...],
                             preferred_element_type=jnp.float32)
                     + cls_b_ref[...])

    # masked-LM transform + tied-embedding logits
    h2 = _gelu(jnp.dot(hm_ref[...], lin_w_ref[...],
                       preferred_element_type=jnp.float32) + lin_b_ref[...])
    lm_ref[...] = lax.dot_general(h2, emb_ref[...],
                                  (((1,), (1,)), ((), ())),
                                  preferred_element_type=jnp.float32)


# --------------------------- wrappers ----------------------------------------
def encoder_stack(emb2d, pad_mask, p):
    """emb2d: (B*S, D) float32, pad_mask: (B, S) float32 (1.0 == pad key)."""
    M, D = emb2d.shape

    def stacked(arr):   # per-layer stacked weight: (L, ...) -> block (1, ...)
        return pl.BlockSpec((1,) + arr.shape[1:], lambda l: (l, 0, 0))

    def whole(arr):     # layer-invariant 2-D input, resident across layers
        return pl.BlockSpec(arr.shape, lambda l: (0, 0))

    in_specs = [
        whole(pad_mask), whole(emb2d),
        stacked(p["wqkv"]), stacked(p["bqkv"]),
        stacked(p["wo"]),   stacked(p["bo"]),
        stacked(p["ln_g"]), stacked(p["ln_b"]),
        stacked(p["w1"]),   stacked(p["b1"]),
        stacked(p["w2"]),   stacked(p["b2"]),
    ]
    return pl.pallas_call(
        encoder_stack_kernel,
        out_shape=jax.ShapeDtypeStruct((M, D), jnp.float32),
        grid=(N_LAYERS,),
        in_specs=in_specs,
        out_specs=pl.BlockSpec((M, D), lambda l: (0, 0)),
        scratch_shapes=[pltpu.VMEM((M, D), jnp.float32),             # act carry
                        pltpu.VMEM((M, N_HEADS * D_V), jnp.float32)],  # head ctx
        compiler_params=pltpu.CompilerParams(
            dimension_semantics=("arbitrary",)),   # sequential layer dependence
    )(pad_mask, emb2d,
      p["wqkv"], p["bqkv"], p["wo"], p["bo"],
      p["ln_g"], p["ln_b"], p["w1"], p["b1"], p["w2"], p["b2"])


def bert_head(cls_h, h_masked, p):
    """cls_h: (B, D), h_masked: (B*N_PRED, D)."""
    B = cls_h.shape[0]
    M = h_masked.shape[0]
    return pl.pallas_call(
        head_kernel,
        out_shape=(jax.ShapeDtypeStruct((M, VOCAB_SIZE), jnp.float32),
                   jax.ShapeDtypeStruct((B, 2), jnp.float32)),
    )(cls_h, h_masked,
      p["fc_w"], p["fc_b"], p["cls_w"], p["cls_b"],
      p["lin_w"], p["lin_b"], p["tok_embed"])


# ---------------------------- parameter init ---------------------------------
def init_params(key):
    keys = iter(jax.random.split(key, 32))

    def rnd(shape, scale=0.02):
        return (scale * jax.random.normal(next(keys), shape)).astype(jnp.float32)

    return {
        "tok_embed": rnd((VOCAB_SIZE, D_MODEL), 1.0),
        "seg_embed": rnd((N_SEGMENTS, D_MODEL), 1.0),
        "pos_embed": rnd((MAXLEN, D_MODEL), 1.0),
        # encoder layers, stacked along a leading layer axis
        "wqkv": rnd((N_LAYERS, D_MODEL, 3 * N_HEADS * D_K)),   # [Wq | Wk | Wv]
        "bqkv": rnd((N_LAYERS, 1, 3 * N_HEADS * D_K)),
        "wo":   rnd((N_LAYERS, N_HEADS * D_V, D_MODEL)),
        "bo":   rnd((N_LAYERS, 1, D_MODEL)),
        "ln_g": jnp.ones((N_LAYERS, 1, D_MODEL), jnp.float32),
        "ln_b": jnp.zeros((N_LAYERS, 1, D_MODEL), jnp.float32),
        "w1":   rnd((N_LAYERS, D_MODEL, D_FF)),
        "b1":   rnd((N_LAYERS, 1, D_FF)),
        "w2":   rnd((N_LAYERS, D_FF, D_MODEL)),
        "b2":   rnd((N_LAYERS, 1, D_MODEL)),
        # pooler fc (Linear + Dropout + Tanh)
        "fc_w": rnd((D_MODEL, D_MODEL)), "fc_b": rnd((1, D_MODEL)),
        # classifier
        "cls_w": rnd((D_MODEL, 2)), "cls_b": rnd((1, 2)),
        # masked-LM transform linear
        "lin_w": rnd((D_MODEL, D_MODEL)), "lin_b": rnd((1, D_MODEL)),
    }


# ------------------------------ BERT forward ---------------------------------
@jax.jit
def bert_forward(params, input_ids, segment_ids, masked_pos):
    B, S = input_ids.shape

    # Embedding (NO LayerNorm applied, matching the reference forward).
    # Gathers are left to XLA (cheap, no clean rectangular-tile equivalent).
    pos = jnp.arange(S, dtype=jnp.int32)[None, :]
    emb = (jnp.take(params["tok_embed"], input_ids, axis=0)
           + jnp.take(params["pos_embed"], jnp.broadcast_to(pos, (B, S)), axis=0)
           + jnp.take(params["seg_embed"], segment_ids, axis=0))     # (B,S,D)

    # get_attn_pad_mask, but kept as a (B, S) vector; broadcast in-kernel.
    pad = (input_ids == 0).astype(jnp.float32)                       # (B,S)

    # full encoder stack (both layers, whole batch) in ONE pallas_call
    out2d = encoder_stack(emb.reshape(B * S, D_MODEL), pad, params)  # (B*S,D)
    output = out2d.reshape(B, S, D_MODEL)

    # [CLS] row + masked-position gather (XLA), then one fused head kernel
    cls_h = output[:, 0, :]                                          # (B,D)
    idx = jnp.broadcast_to(masked_pos[:, :, None], (B, N_PRED, D_MODEL))
    h_masked = jnp.take_along_axis(output, idx, axis=1)              # (B,P,D)

    logits_lm, logits_clsf = bert_head(
        cls_h, h_masked.reshape(B * N_PRED, D_MODEL), params)

    return logits_lm.reshape(B, N_PRED, VOCAB_SIZE), logits_clsf


# ----------------------------------- main ------------------------------------
if __name__ == "__main__":
    key = jax.random.PRNGKey(0)
    pkey, ikey, skey, mkey = jax.random.split(key, 4)

    params = init_params(pkey)

    # deterministic example inputs; trailing zeros act as PAD tokens
    input_ids = jax.random.randint(ikey, (BATCH, SEQ_LEN), 1, VOCAB_SIZE,
                                   dtype=jnp.int32)
    input_ids = input_ids.at[:, -2:].set(0)                 # pad tokens
    segment_ids = jnp.concatenate(
        [jnp.zeros((BATCH, SEQ_LEN // 2), jnp.int32),
         jnp.ones((BATCH, SEQ_LEN // 2), jnp.int32)], axis=1)
    masked_pos = jax.random.randint(mkey, (BATCH, N_PRED), 0, SEQ_LEN - 2,
                                    dtype=jnp.int32)

    logits_lm, logits_clsf = bert_forward(params, input_ids, segment_ids,
                                          masked_pos)
    jax.block_until_ready((logits_lm, logits_clsf))

    assert logits_lm.shape == (BATCH, N_PRED, VOCAB_SIZE)
    assert logits_clsf.shape == (BATCH, 2)
    assert bool(jnp.all(jnp.isfinite(logits_lm))) and bool(jnp.all(jnp.isfinite(logits_clsf)))
    print("KERNEL_OK")
</pallas_src>

<mosaic_0001>
module attributes {stable_mosaic.version = 11 : i64} {
  func.func @encoder_stack_kernel(%arg0: i32, %arg1: memref<2x8xf32, #tpu.memory_space<vmem>>, %arg2: memref<16x32xf32, #tpu.memory_space<vmem>>, %arg3: memref<1x32x96xf32, #tpu.memory_space<vmem>>, %arg4: memref<1x1x96xf32, #tpu.memory_space<vmem>>, %arg5: memref<1x32x32xf32, #tpu.memory_space<vmem>>, %arg6: memref<1x1x32xf32, #tpu.memory_space<vmem>>, %arg7: memref<1x1x32xf32, #tpu.memory_space<vmem>>, %arg8: memref<1x1x32xf32, #tpu.memory_space<vmem>>, %arg9: memref<1x32x64xf32, #tpu.memory_space<vmem>>, %arg10: memref<1x1x64xf32, #tpu.memory_space<vmem>>, %arg11: memref<1x64x32xf32, #tpu.memory_space<vmem>>, %arg12: memref<1x1x32xf32, #tpu.memory_space<vmem>>, %arg13: memref<16x32xf32, #tpu.memory_space<vmem>>, %arg14: memref<16x32xf32, #tpu.memory_space<vmem>>, %arg15: memref<16x32xf32, #tpu.memory_space<vmem>>) attributes {dimension_semantics = [#tpu.dimension_semantics<arbitrary>], iteration_bounds = array<i64: 2>, scalar_prefetch = 0 : i64, scratch_operands = 2 : i64, tpu.core_type = #tpu.core_type<tc>, window_params = [{pipeline_mode = #tpu.pipeline_mode<synchronous>, transform_indices = @transform_0, window_bounds = array<i64: 2, 8>}, {pipeline_mode = #tpu.pipeline_mode<synchronous>, transform_indices = @transform_1, window_bounds = array<i64: 16, 32>}, {transform_indices = @transform_2, window_bounds = array<i64: 1, 32, 96>}, {transform_indices = @transform_3, window_bounds = array<i64: 1, 1, 96>}, {transform_indices = @transform_4, window_bounds = array<i64: 1, 32, 32>}, {transform_indices = @transform_5, window_bounds = array<i64: 1, 1, 32>}, {transform_indices = @transform_6, window_bounds = array<i64: 1, 1, 32>}, {transform_indices = @transform_7, window_bounds = array<i64: 1, 1, 32>}, {transform_indices = @transform_8, window_bounds = array<i64: 1, 32, 64>}, {transform_indices = @transform_9, window_bounds = array<i64: 1, 1, 64>}, {transform_indices = @transform_10, window_bounds = array<i64: 1, 64, 32>}, {transform_indices = @transform_11, window_bounds = array<i64: 1, 1, 32>}, {pipeline_mode = #tpu.pipeline_mode<synchronous>, transform_indices = @transform_12, window_bounds = array<i64: 16, 32>}]} {
    %c0_i32 = arith.constant 0 : i32
    %0 = arith.cmpi eq, %arg0, %c0_i32 : i32
    %1 = arith.extui %0 : i1 to i32
    %c0_i32_0 = arith.constant 0 : i32
    %2 = arith.cmpi ne, %1, %c0_i32_0 : i32
    scf.if %2 {
      %c0_67 = arith.constant 0 : index
      %c0_68 = arith.constant 0 : index
      %127 = vector.load %arg2[%c0_67, %c0_68] : memref<16x32xf32, #tpu.memory_space<vmem>>, vector<16x32xf32>
      %c0_69 = arith.constant 0 : index
      %c0_70 = arith.constant 0 : index
      %128 = vector.load %arg14[%c0_69, %c0_70] : memref<16x32xf32, #tpu.memory_space<vmem>>, vector<16x32xf32>
      tpu.vector_store %arg14[%c0_69, %c0_70], %127 {strides = array<i32>} : memref<16x32xf32, #tpu.memory_space<vmem>>, vector<16x32xf32>,
    } else {
    }
    %c0 = arith.constant 0 : index
    %c0_1 = arith.constant 0 : index
    %3 = vector.load %arg14[%c0, %c0_1] : memref<16x32xf32, #tpu.memory_space<vmem>>, vector<16x32xf32>
    %c0_2 = arith.constant 0 : index
    %c0_3 = arith.constant 0 : index
    %4 = vector.load %arg1[%c0_2, %c0_3] : memref<2x8xf32, #tpu.memory_space<vmem>>, vector<2x8xf32>
    %5 = vector.shape_cast %4 : vector<2x8xf32> to vector<2x1x8xf32>
    %6 = vector.shape_cast %5 : vector<2x1x8xf32> to vector<2x1x8xf32>
    %7 = vector.broadcast %6 : vector<2x1x8xf32> to vector<2x8x8xf32>
    %cst = arith.constant 5.000000e-01 : f32
    %8 = vector.broadcast %cst : f32 to vector<2x8x8xf32>
    %9 = arith.cmpf ogt, %7, %8 : vector<2x8x8xf32>
    %c0_4 = arith.constant 0 : index
    %c0_5 = arith.constant 0 : index
    %c0_6 = arith.constant 0 : index
    %10 = vector.load %arg3[%c0_4, %c0_5, %c0_6] : memref<1x32x96xf32, #tpu.memory_space<vmem>>, vector<1x32x96xf32>
    %11 = vector.shape_cast %10 : vector<1x32x96xf32> to vector<32x96xf32>
    %cst_7 = arith.constant dense<0.000000e+00> : vector<16x96xf32>
    %12 = tpu.matmul %3, %11, %cst_7 {dimension_numbers = #tpu.dot_dimension_numbers<[1], [0], [0], [1], [0, 0, 1, 1], [], []>} : vector<16x32xf32>, vector<32x96xf32>, vector<16x96xf32> -> vector<16x96xf32>
    %c0_8 = arith.constant 0 : index
    %c0_9 = arith.constant 0 : index
    %c0_10 = arith.constant 0 : index
    %13 = vector.load %arg4[%c0_8, %c0_9, %c0_10] : memref<1x1x96xf32, #tpu.memory_space<vmem>>, vector<1x1x96xf32>
    %14 = vector.shape_cast %13 : vector<1x1x96xf32> to vector<1x96xf32>
    %15 = vector.broadcast %14 : vector<1x96xf32> to vector<16x96xf32>
    %16 = arith.addf %12, %15 : vector<16x96xf32>
    %17 = vector.extract_strided_slice %16 {offsets = [0, 0], sizes = [16, 32], strides = [1, 1]} : vector<16x96xf32> to vector<16x32xf32>
    %18 = vector.extract_strided_slice %16 {offsets = [0, 32], sizes = [16, 32], strides = [1, 1]} : vector<16x96xf32> to vector<16x32xf32>
    %19 = vector.extract_strided_slice %16 {offsets = [0, 64], sizes = [16, 32], strides = [1, 1]} : vector<16x96xf32> to vector<16x32xf32>
    %20 = vector.extract_strided_slice %17 {offsets = [0, 0], sizes = [16, 16], strides = [1, 1]} : vector<16x32xf32> to vector<16x16xf32>
    %21 = vector.shape_cast %20 : vector<16x16xf32> to vector<2x8x16xf32>
    %22 = vector.extract_strided_slice %18 {offsets = [0, 0], sizes = [16, 16], strides = [1, 1]} : vector<16x32xf32> to vector<16x16xf32>
    %23 = vector.shape_cast %22 : vector<16x16xf32> to vector<2x8x16xf32>
    %24 = vector.extract_strided_slice %19 {offsets = [0, 0], sizes = [16, 16], strides = [1, 1]} : vector<16x32xf32> to vector<16x16xf32>
    %25 = vector.shape_cast %24 : vector<16x16xf32> to vector<2x8x16xf32>
    "tpu.trace_start"() <{level = 10 : i32, message = "bqd,bkd->bqk"}> : () -> ()
    %cst_11 = arith.constant dense<0.000000e+00> : vector<2x8x8xf32>
    %26 = tpu.matmul %21, %23, %cst_11 {dimension_numbers = #tpu.dot_dimension_numbers<[2], [2], [1], [1], [0, 0, 0, 1, 1, 1], [0], [0]>} : vector<2x8x16xf32>, vector<2x8x16xf32>, vector<2x8x8xf32> -> vector<2x8x8xf32>
    "tpu.trace_stop"() : () -> ()
    %cst_12 = arith.constant 2.500000e-01 : f32
    %27 = vector.broadcast %cst_12 : f32 to vector<2x8x8xf32>
    %28 = arith.mulf %26, %27 : vector<2x8x8xf32>
    %cst_13 = arith.constant 9.99999971E-10 : f32
    %29 = vector.broadcast %cst_13 : f32 to vector<2x8x8xf32>
    %30 = arith.select %9, %29, %28 : vector<2x8x8xi1>, vector<2x8x8xf32>
    %cst_14 = arith.constant dense<0xFF800000> : vector<2x8xf32>
    %31 = vector.multi_reduction <maximumf>, %30, %cst_14 [2] : vector<2x8x8xf32> to vector<2x8xf32>
    %32 = vector.shape_cast %31 : vector<2x8xf32> to vector<2x8x1xf32>
    %33 = vector.broadcast %32 : vector<2x8x1xf32> to vector<2x8x8xf32>
    %34 = arith.subf %30, %33 : vector<2x8x8xf32>
    %35 = math.exp %34 : vector<2x8x8xf32>
    %cst_15 = arith.constant dense<0.000000e+00> : vector<2x8xf32>
    %36 = vector.multi_reduction <add>, %35, %cst_15 [2] : vector<2x8x8xf32> to vector<2x8xf32>
    %37 = vector.shape_cast %36 : vector<2x8xf32> to vector<2x8x1xf32>
    %38 = tpu.reciprocal %37 {approx = true} : vector<2x8x1xf32> -> vector<2x8x1xf32>
    %39 = vector.broadcast %38 : vector<2x8x1xf32> to vector<2x8x8xf32>
    %40 = arith.mulf %35, %39 : vector<2x8x8xf32>
    "tpu.trace_start"() <{level = 10 : i32, message = "bqk,bkd->bqd"}> : () -> ()
    %cst_16 = arith.constant dense<0.000000e+00> : vector<2x8x16xf32>
    %41 = tpu.matmul %40, %25, %cst_16 {dimension_numbers = #tpu.dot_dimension_numbers<[2], [1], [1], [2], [0, 0, 0, 1, 1, 2], [0], [0]>} : vector<2x8x8xf32>, vector<2x8x16xf32>, vector<2x8x16xf32> -> vector<2x8x16xf32>
    "tpu.trace_stop"() : () -> ()
    %42 = vector.shape_cast %41 : vector<2x8x16xf32> to vector<16x16xf32>
    %c0_17 = arith.constant 0 : index
    %c0_18 = arith.constant 0 : index
    %43 = vector.load %arg15[%c0_17, %c0_18] : memref<16x32xf32, #tpu.memory_space<vmem>>, vector<16x16xf32>
    tpu.vector_store %arg15[%c0_17, %c0_18], %42 {strides = array<i32>} : memref<16x32xf32, #tpu.memory_space<vmem>>, vector<16x16xf32>,
    %44 = vector.extract_strided_slice %17 {offsets = [0, 16], sizes = [16, 16], strides = [1, 1]} : vector<16x32xf32> to vector<16x16xf32>
    %45 = vector.shape_cast %44 : vector<16x16xf32> to vector<2x8x16xf32>
    %46 = vector.extract_strided_slice %18 {offsets = [0, 16], sizes = [16, 16], strides = [1, 1]} : vector<16x32xf32> to vector<16x16xf32>
    %47 = vector.shape_cast %46 : vector<16x16xf32> to vector<2x8x16xf32>
    %48 = vector.extract_strided_slice %19 {offsets = [0, 16], sizes = [16, 16], strides = [1, 1]} : vector<16x32xf32> to vector<16x16xf32>
    %49 = vector.shape_cast %48 : vector<16x16xf32> to vector<2x8x16xf32>
    "tpu.trace_start"() <{level = 10 : i32, message = "bqd,bkd->bqk"}> : () -> ()
    %cst_19 = arith.constant dense<0.000000e+00> : vector<2x8x8xf32>
    %50 = tpu.matmul %45, %47, %cst_19 {dimension_numbers = #tpu.dot_dimension_numbers<[2], [2], [1], [1], [0, 0, 0, 1, 1, 1], [0], [0]>} : vector<2x8x16xf32>, vector<2x8x16xf32>, vector<2x8x8xf32> -> vector<2x8x8xf32>
    "tpu.trace_stop"() : () -> ()
    %cst_20 = arith.constant 2.500000e-01 : f32
    %51 = vector.broadcast %cst_20 : f32 to vector<2x8x8xf32>
    %52 = arith.mulf %50, %51 : vector<2x8x8xf32>
    %cst_21 = arith.constant 9.99999971E-10 : f32
    %53 = vector.broadcast %cst_21 : f32 to vector<2x8x8xf32>
    %54 = arith.select %9, %53, %52 : vector<2x8x8xi1>, vector<2x8x8xf32>
    %cst_22 = arith.constant dense<0xFF800000> : vector<2x8xf32>
    %55 = vector.multi_reduction <maximumf>, %54, %cst_22 [2] : vector<2x8x8xf32> to vector<2x8xf32>
    %56 = vector.shape_cast %55 : vector<2x8xf32> to vector<2x8x1xf32>
    %57 = vector.broadcast %56 : vector<2x8x1xf32> to vector<2x8x8xf32>
    %58 = arith.subf %54, %57 : vector<2x8x8xf32>
    %59 = math.exp %58 : vector<2x8x8xf32>
    %cst_23 = arith.constant dense<0.000000e+00> : vector<2x8xf32>
    %60 = vector.multi_reduction <add>, %59, %cst_23 [2] : vector<2x8x8xf32> to vector<2x8xf32>
    %61 = vector.shape_cast %60 : vector<2x8xf32> to vector<2x8x1xf32>
    %62 = tpu.reciprocal %61 {approx = true} : vector<2x8x1xf32> -> vector<2x8x1xf32>
    %63 = vector.broadcast %62 : vector<2x8x1xf32> to vector<2x8x8xf32>
    %64 = arith.mulf %59, %63 : vector<2x8x8xf32>
    "tpu.trace_start"() <{level = 10 : i32, message = "bqk,bkd->bqd"}> : () -> ()
    %cst_24 = arith.constant dense<0.000000e+00> : vector<2x8x16xf32>
    %65 = tpu.matmul %64, %49, %cst_24 {dimension_numbers = #tpu.dot_dimension_numbers<[2], [1], [1], [2], [0, 0, 0, 1, 1, 2], [0], [0]>} : vector<2x8x8xf32>, vector<2x8x16xf32>, vector<2x8x16xf32> -> vector<2x8x16xf32>
    "tpu.trace_stop"() : () -> ()
    %66 = vector.shape_cast %65 : vector<2x8x16xf32> to vector<16x16xf32>
    %c0_25 = arith.constant 0 : index
    %c16 = arith.constant 16 : index
    %67 = vector.load %arg15[%c0_25, %c16] : memref<16x32xf32, #tpu.memory_space<vmem>>, vector<16x16xf32>
    tpu.vector_store %arg15[%c0_25, %c16], %66 {strides = array<i32>} : memref<16x32xf32, #tpu.memory_space<vmem>>, vector<16x16xf32>,
    %c0_26 = arith.constant 0 : index
    %c0_27 = arith.constant 0 : index
    %68 = vector.load %arg15[%c0_26, %c0_27] : memref<16x32xf32, #tpu.memory_space<vmem>>, vector<16x32xf32>
    %c0_28 = arith.constant 0 : index
    %c0_29 = arith.constant 0 : index
    %c0_30 = arith.constant 0 : index
    %69 = vector.load %arg5[%c0_28, %c0_29, %c0_30] : memref<1x32x32xf32, #tpu.memory_space<vmem>>, vector<1x32x32xf32>
    %70 = vector.shape_cast %69 : vector<1x32x32xf32> to vector<32x32xf32>
    %cst_31 = arith.constant dense<0.000000e+00> : vector<16x32xf32>
    %71 = tpu.matmul %68, %70, %cst_31 {dimension_numbers = #tpu.dot_dimension_numbers<[1], [0], [0], [1], [0, 0, 1, 1], [], []>} : vector<16x32xf32>, vector<32x32xf32>, vector<16x32xf32> -> vector<16x32xf32>
    %c0_32 = arith.constant 0 : index
    %c0_33 = arith.constant 0 : index
    %c0_34 = arith.constant 0 : index
    %72 = vector.load %arg6[%c0_32, %c0_33, %c0_34] : memref<1x1x32xf32, #tpu.memory_space<vmem>>, vector<1x1x32xf32>
    %73 = vector.shape_cast %72 : vector<1x1x32xf32> to vector<1x32xf32>
    %74 = vector.broadcast %73 : vector<1x32xf32> to vector<16x32xf32>
    %75 = arith.addf %71, %74 : vector<16x32xf32>
    %76 = arith.addf %75, %3 : vector<16x32xf32>
    %cst_35 = arith.constant dense<0.000000e+00> : vector<16xf32>
    %77 = vector.multi_reduction <add>, %76, %cst_35 [1] : vector<16x32xf32> to vector<16xf32>
    %78 = vector.shape_cast %77 : vector<16xf32> to vector<16x1xf32>
    %cst_36 = arith.constant 3.200000e+01 : f32
    %79 = vector.broadcast %cst_36 : f32 to vector<16x1xf32>
    %80 = arith.divf %78, %79 : vector<16x1xf32>
    %81 = vector.broadcast %80 : vector<16x1xf32> to vector<16x32xf32>
    %82 = arith.subf %76, %81 : vector<16x32xf32>
    %83 = arith.mulf %82, %82 : vector<16x32xf32>
    %cst_37 = arith.constant dense<0.000000e+00> : vector<16xf32>
    %84 = vector.multi_reduction <add>, %83, %cst_37 [1] : vector<16x32xf32> to vector<16xf32>
    %85 = vector.shape_cast %84 : vector<16xf32> to vector<16x1xf32>
    %cst_38 = arith.constant 3.200000e+01 : f32
    %86 = vector.broadcast %cst_38 : f32 to vector<16x1xf32>
    %87 = arith.divf %85, %86 : vector<16x1xf32>
    %88 = vector.broadcast %80 : vector<16x1xf32> to vector<16x32xf32>
    %89 = arith.subf %76, %88 : vector<16x32xf32>
    %cst_39 = arith.constant 9.99999974E-6 : f32
    %90 = vector.broadcast %cst_39 : f32 to vector<16x1xf32>
    %91 = arith.addf %87, %90 : vector<16x1xf32>
    %92 = math.rsqrt %91 : vector<16x1xf32>
    %93 = vector.broadcast %92 : vector<16x1xf32> to vector<16x32xf32>
    %94 = arith.mulf %89, %93 : vector<16x32xf32>
    %c0_40 = arith.constant 0 : index
    %c0_41 = arith.constant 0 : index
    %c0_42 = arith.constant 0 : index
    %95 = vector.load %arg7[%c0_40, %c0_41, %c0_42] : memref<1x1x32xf32, #tpu.memory_space<vmem>>, vector<1x1x32xf32>
    %96 = vector.shape_cast %95 : vector<1x1x32xf32> to vector<1x32xf32>
    %97 = vector.broadcast %96 : vector<1x32xf32> to vector<16x32xf32>
    %98 = arith.mulf %94, %97 : vector<16x32xf32>
    %c0_43 = arith.constant 0 : index
    %c0_44 = arith.constant 0 : index
    %c0_45 = arith.constant 0 : index
    %99 = vector.load %arg8[%c0_43, %c0_44, %c0_45] : memref<1x1x32xf32, #tpu.memory_space<vmem>>, vector<1x1x32xf32>
    %100 = vector.shape_cast %99 : vector<1x1x32xf32> to vector<1x32xf32>
    %101 = vector.broadcast %100 : vector<1x32xf32> to vector<16x32xf32>
    %102 = arith.addf %98, %101 : vector<16x32xf32>
    %c0_46 = arith.constant 0 : index
    %c0_47 = arith.constant 0 : index
    %c0_48 = arith.constant 0 : index
    %103 = vector.load %arg9[%c0_46, %c0_47, %c0_48] : memref<1x32x64xf32, #tpu.memory_space<vmem>>, vector<1x32x64xf32>
    %104 = vector.shape_cast %103 : vector<1x32x64xf32> to vector<32x64xf32>
    %cst_49 = arith.constant dense<0.000000e+00> : vector<16x64xf32>
    %105 = tpu.matmul %102, %104, %cst_49 {dimension_numbers = #tpu.dot_dimension_numbers<[1], [0], [0], [1], [0, 0, 1, 1], [], []>} : vector<16x32xf32>, vector<32x64xf32>, vector<16x64xf32> -> vector<16x64xf32>
    %c0_50 = arith.constant 0 : index
    %c0_51 = arith.constant 0 : index
    %c0_52 = arith.constant 0 : index
    %106 = vector.load %arg10[%c0_50, %c0_51, %c0_52] : memref<1x1x64xf32, #tpu.memory_space<vmem>>, vector<1x1x64xf32>
    %107 = vector.shape_cast %106 : vector<1x1x64xf32> to vector<1x64xf32>
    %108 = vector.broadcast %107 : vector<1x64xf32> to vector<16x64xf32>
    %109 = arith.addf %105, %108 : vector<16x64xf32>
    %cst_53 = arith.constant 5.000000e-01 : f32
    %110 = vector.broadcast %cst_53 : f32 to vector<16x64xf32>
    %111 = arith.mulf %109, %110 : vector<16x64xf32>
    %cst_54 = arith.constant 1.41421354 : f32
    %112 = vector.broadcast %cst_54 : f32 to vector<16x64xf32>
    %113 = arith.divf %109, %112 : vector<16x64xf32>
    %114 = math.erf %113 : vector<16x64xf32>
    %cst_55 = arith.constant 1.000000e+00 : f32
    %115 = vector.broadcast %cst_55 : f32 to vector<16x64xf32>
    %116 = arith.addf %115, %114 : vector<16x64xf32>
    %117 = arith.mulf %111, %116 : vector<16x64xf32>
    %c0_56 = arith.constant 0 : index
    %c0_57 = arith.constant 0 : index
    %c0_58 = arith.constant 0 : index
    %118 = vector.load %arg11[%c0_56, %c0_57, %c0_58] : memref<1x64x32xf32, #tpu.memory_space<vmem>>, vector<1x64x32xf32>
    %119 = vector.shape_cast %118 : vector<1x64x32xf32> to vector<64x32xf32>
    %cst_59 = arith.constant dense<0.000000e+00> : vector<16x32xf32>
    %120 = tpu.matmul %117, %119, %cst_59 {dimension_numbers = #tpu.dot_dimension_numbers<[1], [0], [0], [1], [0, 0, 1, 1], [], []>} : vector<16x64xf32>, vector<64x32xf32>, vector<16x32xf32> -> vector<16x32xf32>
    %c0_60 = arith.constant 0 : index
    %c0_61 = arith.constant 0 : index
    %c0_62 = arith.constant 0 : index
    %121 = vector.load %arg12[%c0_60, %c0_61, %c0_62] : memref<1x1x32xf32, #tpu.memory_space<vmem>>, vector<1x1x32xf32>
    %122 = vector.shape_cast %121 : vector<1x1x32xf32> to vector<1x32xf32>
    %123 = vector.broadcast %122 : vector<1x32xf32> to vector<16x32xf32>
    %124 = arith.addf %120, %123 : vector<16x32xf32>
    %c0_63 = arith.constant 0 : index
    %c0_64 = arith.constant 0 : index
    %125 = vector.load %arg14[%c0_63, %c0_64] : memref<16x32xf32, #tpu.memory_space<vmem>>, vector<16x32xf32>
    tpu.vector_store %arg14[%c0_63, %c0_64], %124 {strides = array<i32>} : memref<16x32xf32, #tpu.memory_space<vmem>>, vector<16x32xf32>,
    %c0_65 = arith.constant 0 : index
    %c0_66 = arith.constant 0 : index
    %126 = vector.load %arg13[%c0_65, %c0_66] : memref<16x32xf32, #tpu.memory_space<vmem>>, vector<16x32xf32>
    tpu.vector_store %arg13[%c0_65, %c0_66], %124 {strides = array<i32>} : memref<16x32xf32, #tpu.memory_space<vmem>>, vector<16x32xf32>,
    return
  }
  func.func @transform_0(%arg0: i32) -> (i32, i32) {
    %c0_i32 = arith.constant 0 : i32
    %c0_i32_0 = arith.constant 0 : i32
    %c0_i32_1 = arith.constant 0 : i32
    return %c0_i32, %c0_i32_0 : i32, i32
  }
  func.func @transform_1(%arg0: i32) -> (i32, i32) {
    %c0_i32 = arith.constant 0 : i32
    %c0_i32_0 = arith.constant 0 : i32
    %c0_i32_1 = arith.constant 0 : i32
    return %c0_i32, %c0_i32_0 : i32, i32
  }
  func.func @transform_2(%arg0: i32) -> (i32, i32, i32) {
    %c0_i32 = arith.constant 0 : i32
    %c0_i32_0 = arith.constant 0 : i32
    %c0_i32_1 = arith.constant 0 : i32
    return %arg0, %c0_i32, %c0_i32_0 : i32, i32, i32
  }
  func.func @transform_3(%arg0: i32) -> (i32, i32, i32) {
    %c0_i32 = arith.constant 0 : i32
    %c0_i32_0 = arith.constant 0 : i32
    %c0_i32_1 = arith.constant 0 : i32
    return %arg0, %c0_i32, %c0_i32_0 : i32, i32, i32
  }
  func.func @transform_4(%arg0: i32) -> (i32, i32, i32) {
    %c0_i32 = arith.constant 0 : i32
    %c0_i32_0 = arith.constant 0 : i32
    %c0_i32_1 = arith.constant 0 : i32
    return %arg0, %c0_i32, %c0_i32_0 : i32, i32, i32
  }
  func.func @transform_5(%arg0: i32) -> (i32, i32, i32) {
    %c0_i32 = arith.constant 0 : i32
    %c0_i32_0 = arith.constant 0 : i32
    %c0_i32_1 = arith.constant 0 : i32
    return %arg0, %c0_i32, %c0_i32_0 : i32, i32, i32
  }
  func.func @transform_6(%arg0: i32) -> (i32, i32, i32) {
    %c0_i32 = arith.constant 0 : i32
    %c0_i32_0 = arith.constant 0 : i32
    %c0_i32_1 = arith.constant 0 : i32
    return %arg0, %c0_i32, %c0_i32_0 : i32, i32, i32
  }
  func.func @transform_7(%arg0: i32) -> (i32, i32, i32) {
    %c0_i32 = arith.constant 0 : i32
    %c0_i32_0 = arith.constant 0 : i32
    %c0_i32_1 = arith.constant 0 : i32
    return %arg0, %c0_i32, %c0_i32_0 : i32, i32, i32
  }
  func.func @transform_8(%arg0: i32) -> (i32, i32, i32) {
    %c0_i32 = arith.constant 0 : i32
    %c0_i32_0 = arith.constant 0 : i32
    %c0_i32_1 = arith.constant 0 : i32
    return %arg0, %c0_i32, %c0_i32_0 : i32, i32, i32
  }
  func.func @transform_9(%arg0: i32) -> (i32, i32, i32) {
    %c0_i32 = arith.constant 0 : i32
    %c0_i32_0 = arith.constant 0 : i32
    %c0_i32_1 = arith.constant 0 : i32
    return %arg0, %c0_i32, %c0_i32_0 : i32, i32, i32
  }
  func.func @transform_10(%arg0: i32) -> (i32, i32, i32) {
    %c0_i32 = arith.constant 0 : i32
    %c0_i32_0 = arith.constant 0 : i32
    %c0_i32_1 = arith.constant 0 : i32
    return %arg0, %c0_i32, %c0_i32_0 : i32, i32, i32
  }
  func.func @transform_11(%arg0: i32) -> (i32, i32, i32) {
    %c0_i32 = arith.constant 0 : i32
    %c0_i32_0 = arith.constant 0 : i32
    %c0_i32_1 = arith.constant 0 : i32
    return %arg0, %c0_i32, %c0_i32_0 : i32, i32, i32
  }
  func.func @transform_12(%arg0: i32) -> (i32, i32) {
    %c0_i32 = arith.constant 0 : i32
    %c0_i32_0 = arith.constant 0 : i32
    %c0_i32_1 = arith.constant 0 : i32
    return %c0_i32, %c0_i32_0 : i32, i32
  }
}

module attributes {stable_mosaic.version = 11 : i64} {
  func.func @head_kernel(%arg0: memref<2x32xf32, #tpu.memory_space<vmem>>, %arg1: memref<6x32xf32, #tpu.memory_space<vmem>>, %arg2: memref<32x32xf32, #tpu.memory_space<vmem>>, %arg3: memref<1x32xf32, #tpu.memory_space<vmem>>, %arg4: memref<32x2xf32, #tpu.memory_space<vmem>>, %arg5: memref<1x2xf32, #tpu.memory_space<vmem>>, %arg6: memref<32x32xf32, #tpu.memory_space<vmem>>, %arg7: memref<1x32xf32, #tpu.memory_space<vmem>>, %arg8: memref<24x32xf32, #tpu.memory_space<vmem>>, %arg9: memref<6x24xf32, #tpu.memory_space<vmem>>, %arg10: memref<2x2xf32, #tpu.memory_space<vmem>>) attributes {dimension_semantics = [], scalar_prefetch = 0 : i64, scratch_operands = 0 : i64, tpu.core_type = #tpu.core_type<tc>} {
    %c0 = arith.constant 0 : index
    %c0_0 = arith.constant 0 : index
    %0 = vector.load %arg0[%c0, %c0_0] : memref<2x32xf32, #tpu.memory_space<vmem>>, vector<2x32xf32>
    %c0_1 = arith.constant 0 : index
    %c0_2 = arith.constant 0 : index
    %1 = vector.load %arg2[%c0_1, %c0_2] : memref<32x32xf32, #tpu.memory_space<vmem>>, vector<32x32xf32>
    %cst = arith.constant dense<0.000000e+00> : vector<2x32xf32>
    %2 = tpu.matmul %0, %1, %cst {dimension_numbers = #tpu.dot_dimension_numbers<[1], [0], [0], [1], [0, 0, 1, 1], [], []>} : vector<2x32xf32>, vector<32x32xf32>, vector<2x32xf32> -> vector<2x32xf32>
    %c0_3 = arith.constant 0 : index
    %c0_4 = arith.constant 0 : index
    %3 = vector.load %arg3[%c0_3, %c0_4] : memref<1x32xf32, #tpu.memory_space<vmem>>, vector<1x32xf32>
    %4 = vector.broadcast %3 : vector<1x32xf32> to vector<2x32xf32>
    %5 = arith.addf %2, %4 : vector<2x32xf32>
    %6 = math.tanh %5 : vector<2x32xf32>
    %c0_5 = arith.constant 0 : index
    %c0_6 = arith.constant 0 : index
    %7 = vector.load %arg4[%c0_5, %c0_6] : memref<32x2xf32, #tpu.memory_space<vmem>>, vector<32x2xf32>
    %cst_7 = arith.constant dense<0.000000e+00> : vector<2x2xf32>
    %8 = tpu.matmul %6, %7, %cst_7 {dimension_numbers = #tpu.dot_dimension_numbers<[1], [0], [0], [1], [0, 0, 1, 1], [], []>} : vector<2x32xf32>, vector<32x2xf32>, vector<2x2xf32> -> vector<2x2xf32>
    %c0_8 = arith.constant 0 : index
    %c0_9 = arith.constant 0 : index
    %9 = vector.load %arg5[%c0_8, %c0_9] : memref<1x2xf32, #tpu.memory_space<vmem>>, vector<1x2xf32>
    %10 = vector.broadcast %9 : vector<1x2xf32> to vector<2x2xf32>
    %11 = arith.addf %8, %10 : vector<2x2xf32>
    %c0_10 = arith.constant 0 : index
    %c0_11 = arith.constant 0 : index
    %12 = vector.load %arg10[%c0_10, %c0_11] : memref<2x2xf32, #tpu.memory_space<vmem>>, vector<2x2xf32>
    tpu.vector_store %arg10[%c0_10, %c0_11], %11 {strides = array<i32>} : memref<2x2xf32, #tpu.memory_space<vmem>>, vector<2x2xf32>,
    %c0_12 = arith.constant 0 : index
    %c0_13 = arith.constant 0 : index
    %13 = vector.load %arg1[%c0_12, %c0_13] : memref<6x32xf32, #tpu.memory_space<vmem>>, vector<6x32xf32>
    %c0_14 = arith.constant 0 : index
    %c0_15 = arith.constant 0 : index
    %14 = vector.load %arg6[%c0_14, %c0_15] : memref<32x32xf32, #tpu.memory_space<vmem>>, vector<32x32xf32>
    %cst_16 = arith.constant dense<0.000000e+00> : vector<6x32xf32>
    %15 = tpu.matmul %13, %14, %cst_16 {dimension_numbers = #tpu.dot_dimension_numbers<[1], [0], [0], [1], [0, 0, 1, 1], [], []>} : vector<6x32xf32>, vector<32x32xf32>, vector<6x32xf32> -> vector<6x32xf32>
    %c0_17 = arith.constant 0 : index
    %c0_18 = arith.constant 0 : index
    %16 = vector.load %arg7[%c0_17, %c0_18] : memref<1x32xf32, #tpu.memory_space<vmem>>, vector<1x32xf32>
    %17 = vector.broadcast %16 : vector<1x32xf32> to vector<6x32xf32>
    %18 = arith.addf %15, %17 : vector<6x32xf32>
    %cst_19 = arith.constant 5.000000e-01 : f32
    %19 = vector.broadcast %cst_19 : f32 to vector<6x32xf32>
    %20 = arith.mulf %18, %19 : vector<6x32xf32>
    %cst_20 = arith.constant 1.41421354 : f32
    %21 = vector.broadcast %cst_20 : f32 to vector<6x32xf32>
    %22 = arith.divf %18, %21 : vector<6x32xf32>
    %23 = math.erf %22 : vector<6x32xf32>
    %cst_21 = arith.constant 1.000000e+00 : f32
    %24 = vector.broadcast %cst_21 : f32 to vector<6x32xf32>
    %25 = arith.addf %24, %23 : vector<6x32xf32>
    %26 = arith.mulf %20, %25 : vector<6x32xf32>
    %c0_22 = arith.constant 0 : index
    %c0_23 = arith.constant 0 : index
    %27 = vector.load %arg8[%c0_22, %c0_23] : memref<24x32xf32, #tpu.memory_space<vmem>>, vector<24x32xf32>
    %cst_24 = arith.constant dense<0.000000e+00> : vector<6x24xf32>
    %28 = tpu.matmul %26, %27, %cst_24 {dimension_numbers = #tpu.dot_dimension_numbers<[1], [1], [0], [0], [0, 0, 1, 0], [], []>} : vector<6x32xf32>, vector<24x32xf32>, vector<6x24xf32> -> vector<6x24xf32>
    %c0_25 = arith.constant 0 : index
    %c0_26 = arith.constant 0 : index
    %29 = vector.load %arg9[%c0_25, %c0_26] : memref<6x24xf32, #tpu.memory_space<vmem>>, vector<6x24xf32>
    tpu.vector_store %arg9[%c0_25, %c0_26], %28 {strides = array<i32>} : memref<6x24xf32, #tpu.memory_space<vmem>>, vector<6x24xf32>,
    return
  }
}

</mosaic_0001>

<bundles_post_ra>
// kernel: bert_forward.3
= control target key start
LH: loop header
LB: loop body
LE: loop exit
PB: predicated region body
PF: predicated region fallthrough
CT: control target
= control target key end

     0   :  { %v529_v3 = vmov 0.0|0.0   ;;  %vm530_vm0 = vmmov 0   ;;  %v531_v6 = vmov 0.0   ;;  %s674_s0 = inlined_call_operand.vmem [shape: f32[2,32], index: 0, kind: input, shape index: {}]   ;;  %s675_s1 = inlined_call_operand.vmem [shape: f32[6,32], index: 1, kind: input, shape index: {}]   ;;  %s676_s2 = inlined_call_operand.vmem [shape: f32[32,32], index: 2, kind: input, shape index: {}]   ;;  %s677_s3 = inlined_call_operand.vmem [shape: f32[1,32], index: 3, kind: input, shape index: {}]   ;;  %s678_s4 = inlined_call_operand.vmem [shape: f32[32,2], index: 4, kind: input, shape index: {}]   ;;  %s679_s5 = inlined_call_operand.vmem [shape: f32[1,2], index: 5, kind: input, shape index: {}]   ;;  %s680_s6 = inlined_call_operand.vmem [shape: f32[32,32], index: 6, kind: input, shape index: {}]   ;;  %s681_s7 = inlined_call_operand.vmem [shape: f32[1,32], index: 7, kind: input, shape index: {}]   ;;  %s682_s8 = inlined_call_operand.vmem [shape: f32[24,32], index: 8, kind: input, shape index: {}]   ;;  %s683_s9 = inlined_call_operand.vmem [shape: f32[6,24], index: 9, kind: output, shape index: {0}]   ;;  %s684_s10 = inlined_call_operand.hbm [shape: f32[2,2], index: 10, kind: output, shape index: {1}]  }
   0x1   :  { %v36_v0 = vld [vmem:[%s676_s2] sm:$0xff]  ;;  %v37_v1 = vld [vmem:[%s676_s2 + $0x8] sm:$0xff]  ;;  %v38_v2 = vld [vmem:[%s676_s2 + $0x10] sm:$0xff]  ;;  %475 = vmatprep.subr.bf16.mxu0 %v529_v3  ;;  %441 = vmatprep.mubr.msk.f32.mxu0 %vm530_vm0, %v531_v6 }
   0x2   :  { %v476_v4 = vpack.c.bf16 %v37_v1, %v36_v0  ;;  %v39_v5 = vld [vmem:[%s676_s2 + $0x18] sm:$0xff]  ;;  %481 = vmatprep.subr.bf16.mxu1 %v529_v3  ;;  %452 = vmatprep.mubr.msk.f32.mxu1 %vm530_vm0, %v531_v6 }
   0x3   :  { %v479_v7 = vpack.c.bf16 %v39_v5, %v38_v2 }
   0x4   :  { %477 = vmatpush3.bf16.msra.mxu0 %v476_v4 }
   0x5   :  { %16 = vsyncpa [#allocation3], 0  ;;  %478 = vmatprep.subr.bf16.mxu0 %v529_v3  ;;  %v209_v8 = vld [vmem:[%s680_s6] sm:$0xff]  ;;  %v210_v9 = vld [vmem:[%s680_s6 + $0x8] sm:$0xff]  ;;  %vm47_vm1 = vcmask 261120   ;;  %s532_s25 = smov [#allocation2]  }
   0x6   :  { %v35_v10 = vld [vmem:[%s674_s0] sm:$0x3]  ;;  %v488_v11 = vpack.c.bf16 %v210_v9, %v209_v8  ;;  %v211_v12 = vld [vmem:[%s680_s6 + $0x10] sm:$0xff]  ;;  %v212_v13 = vld [vmem:[%s680_s6 + $0x18] sm:$0xff]  ;;  %s394_s26 = sshll.u32 %s532_s25, 4  ;;  %vm206_vm3 = vcmask 9216   ;;  %s395_s26 = int_to_ptr.vmem [resolvable:$true] %s394_s26 }
   0x7   :  { %v491_v14 = vpack.c.bf16 %v212_v13, %v211_v12  ;;  %v208_v15 = vld [vmem:[%s675_s1] sm:$0x3f]  ;;  %v123_v17 = vld [vmem:[%s678_s4 + $0x8] sm:$0xff]  ;;  %v124_v19 = vld [vmem:[%s678_s4 + $0x10] sm:$0xff]  ;;  %p510_p1 = scmp.lt.s32.totalorder %s395_s26, %s395_s26 }
   0x8   :  { %480 = vmatpush3.bf16.msra.mxu0 %v479_v7  ;;  %v122_v16 = vld [vmem:[%s678_s4] sm:$0xff]  ;;  %v125_v20 = vld [vmem:[%s678_s4 + $0x18] sm:$0xff]  ;;  %v300_v29 = vld [vmem:[%s682_s8 + $0x8] sm:$0xff] }
   0x9   :  { %487 = vmatprep.subr.bf16.mxu0 %v529_v3  ;;  %v482_v18 = vpack.c.bf16 %v123_v17, %v122_v16  ;;  %v485_v21 = vpack.c.bf16 %v125_v20, %v124_v19  ;;  %v404_v22 = vld [vmem:[%s677_s3] ss:$0 sm:$0xff]  ;;  %vm495_vm2 = vmpackc.low %vm47_vm1, %vm47_vm1  ;;  %v301_v35 = vld [vmem:[%s682_s8 + $0x10] sm:$0xff] }
   0xa   :  { %v408_v26 = vld [vmem:[%s681_s7] ss:$0 sm:$0xff] }
   0xb   :  { %442 = vmatmul.mubr.msk.f32.vlgmr.msra.gmra.mrb[0].mxu0 %vm47_vm1, %v35_v10  ;;  %483 = vmatpush3.bf16.msra.mxu1 %v482_v18  ;;  %v299_v28 = vld [vmem:[%s682_s8] sm:$0xff]  ;;  %s505_s8 = scalar_lea.vmem %s395_s26, 32 }
   0xc   :  { %489 = vmatpush3.bf16.msra.mxu0 %v488_v11  ;;  %463 = vmatprep.mubr.msk.f32.mxu0 %vm530_vm0, %v531_v6  ;;  %v494_v33 = vpack.c.bf16 %v300_v29, %v299_v28  ;;  %v406_v40 = vld [vmem:[%s679_s5] ss:$0 sm:$0xff]  ;;  %p506_p0 = scmp.ne.s32.totalorder %s395_s26, %s505_s8  ;;  %p511_p2 = scmp.lt.s32.totalorder %s505_s8, %s505_s8 }
   0xd   :  { %490 = vmatprep.subr.bf16.mxu0 %v529_v3  ;;  %484 = vmatprep.subr.bf16.mxu1 %v529_v3 }
   0xe   :  { %p512_p3 = por %p511_p2, %p510_p1 }
   0xf   :  { %486 = vmatpush3.bf16.msra.mxu1 %v485_v21 }
  0x10   :  { %492 = vmatpush3.bf16.msra.mxu0 %v491_v14  ;;  %493 = vmatprep.subr.bf16.mxu1 %v529_v3  ;;  %p513_p4 = pnand %p512_p3, %p506_p0 }
  0x13   :  { %464 = vmatmul.mubr.msk.f32.vlgmr.msra.gmra.mrb[2].mxu0 %vm47_vm1, %v208_v15 }
  0xde   :  { %v117_v23 = vpop.f32.mrb[0].mxu0 }
  0xdf   :  { %v118_v24 = vadd.f32 %v404_v22, %v117_v23  ;;  %v443_v25 = vpop.f32.mrb[1].mxu0 }
  0xe1   :  { %501 = vtanh.f32 %v118_v24 }
  0xe6   :  { %v289_v27 = vpop.f32.mrb[2].mxu0 }
  0xe7   :  { %v290_v30 = vadd.f32 %v408_v26, %v289_v27  ;;  %v465_v31 = vpop.f32.mrb[3].mxu0 }
  0xe9   :  { %v295_v32 = vmul.f32 0.70710677, %v290_v30  ;;  %v293_v37 = vmul.f32 0.5, %v290_v30 }
  0xeb   :  { %v502_v34 = vpop.eup %501  ;;  %503 = verf.f32 %v295_v32 }
  0xec   :  { %453 = vmatmul.mubr.msk.f32.vlgmr.msra.gmra.mrb[0].mxu1 %vm47_vm1, %v502_v34 }
  0xed   :  { %496 = vmatpush3.bf16.xpose.msk.msra.mxu1 %vm495_vm2, %v494_v33  ;;  %472 = vmatprep.mubr.msk.f32.mxu1 %vm530_vm0, %v531_v6 }
  0xee   :  { %470 = vmatprep.subr.mxu1 %v531_v6 }
  0xf5   :  { %v504_v36 = vpop.eup %503  ;;  %471 = vmatpush3.xpose.msk.msra.mxu1 %vm47_vm1, %v301_v35 }
  0xf6   :  { %v297_v38 = vadd.f32 1.0, %v504_v36 }
  0xf8   :  { %v298_v39 = vmul.f32 %v297_v38, %v293_v37 }
  0xfa   :  { %473 = vmatmul.mubr.msk.f32.vlgmr.msra.gmra.mrb[2].mxu1 %vm47_vm1, %v298_v39 }
 0x1bf   :  { %v202_v41 = vpop.f32.mrb[0].mxu1 }
 0x1c0   :  { %v203_v42 = vadd.f32 %v406_v40, %v202_v41  ;;  %v454_v43 = vpop.f32.mrb[1].mxu1 }
 0x1c2   :  { %207 = vst.msk [vmem:[#allocation2] sm:$0x3] %vm206_vm3, %v203_v42 }
 0x1c3   :  { %516 = shalt.err (!%p513_p4)
}
 0x1c4   :  { %s517_s29 = scalar_lea.hbm %s684_s10, 32 }
 0x1c5   :  { %p518_p5 = scmp.ne.s32.totalorder %s684_s10, %s517_s29  ;;  %p521_p6 = scmp.lt.u32.totalorder %s517_s29, %s684_s10 }
 0x1c7   :  { %p523_p7 = pnand %p521_p6, %p518_p5 }
 0x1c9   :  { %526 = shalt.err (!%p523_p7)
}
 0x1ca   :  { %397 = dma.vmem_to_hbm [thread:$0]  %s395_s26, 32, %s684_s10, [#allocation3]   ;;  %vm384_vm4 = vcmask 193536  }
 0x1cd   :  { %v380_v44 = vpop.f32.mrb[2].mxu1 }
 0x1ce   :  { %385 = vst.msk [vmem:[%s683_s9] sm:$0x3f] %vm384_vm4, %v380_v44  ;;  %v474_v45 = vpop.f32.mrb[3].mxu1 }
 0x1cf   :  { %527 = dma.done.wait [#allocation3], 32  }
 0x1d0   :  { %528 = vsyncadd [#allocation3], 4294967264 }
 0x1d1   :  { %403 = vsyncpa [#allocation3], 1 }

// kernel: bert_forward.2
= control target key start
LH: loop header
LB: loop body
LE: loop exit
PB: predicated region body
PF: predicated region fallthrough
CT: control target
= control target key end

     0   :  { %s2172_s21 = smov 0   ;;  %s2388_s0 = inlined_call_operand.vmem [shape: f32[2,8], index: 0, kind: input, shape index: {}]   ;;  %s2389_s1 = inlined_call_operand.vmem [shape: f32[16,32], index: 1, kind: input, shape index: {}]   ;;  %s2390_s2 = inlined_call_operand.vmem [shape: f32[2,32,96], index: 2, kind: input, shape index: {}]   ;;  %s2391_s3 = inlined_call_operand.vmem [shape: f32[2,1,96], index: 3, kind: input, shape index: {}]   ;;  %s2392_s4 = inlined_call_operand.vmem [shape: f32[2,32,32], index: 4, kind: input, shape index: {}]   ;;  %s2393_s5 = inlined_call_operand.vmem [shape: f32[2,1,32], index: 5, kind: input, shape index: {}]   ;;  %s2394_s6 = inlined_call_operand.vmem [shape: f32[2,1,32], index: 6, kind: input, shape index: {}]   ;;  %s2395_s7 = inlined_call_operand.vmem [shape: f32[2,1,32], index: 7, kind: input, shape index: {}]   ;;  %s2396_s8 = inlined_call_operand.vmem [shape: f32[2,32,64], index: 8, kind: input, shape index: {}]   ;;  %s2397_s9 = inlined_call_operand.vmem [shape: f32[2,1,64], index: 9, kind: input, shape index: {}]   ;;  %s2398_s10 = inlined_call_operand.vmem [shape: f32[2,64,32], index: 10, kind: input, shape index: {}]   ;;  %s2399_s11 = inlined_call_operand.vmem [shape: f32[2,1,32], index: 11, kind: input, shape index: {}]   ;;  %s2400_s12 = inlined_call_operand.vmem [shape: f32[16,32], index: 12, kind: output, shape index: {}]  }
   0x1   :  { %2403 = sst [smem:[#allocation5_spill]] %s2390_s2 }
   0x2   :  { %2404 = sst [smem:[#allocation6_spill]] %s2392_s4 }
   0x3   :  { %2405 = sst [smem:[#allocation7_spill]] %s2400_s12 }
   0x4 LB: > { %2406 = sst [smem:[#allocation4_spill]] %s2096_s21  ;;  %s1827_s22 = sadd.s32 4294967295, %s2096_s21   ;;  %s2096_s21 = sphi %s2172_s21, %s22_s21  }
   0x5   : > { %p1830_p0 = scmp.ge.s32.totalorder %s2096_s21, 1  ;;  %p435_p1 = scmp.lt.s32.totalorder %s2096_s21, 3 }
   0x7   : > { %p436_p2 = pnand %p1830_p0, %p435_p1 }
   0x8   : > { %p505_p3 = scmp.lt.s32.totalorder (!%p436_p2), %s1827_s22, 1  ;;  %s2407_s2 = sld [smem:[#allocation5_spill]] (!%p436_p2) }
   0x9   : > { %439 = sbr.rel (%p436_p2) target bundleno = 2752 (0xac0), region = 68  ;;  %s2408_s4 = sld [smem:[#allocation6_spill]] (!%p436_p2) }
   0xa   : > { %p1839_p4 = scmp.ne.s32.totalorder (!%p436_p2), %s1827_s22, 0 }
  0x10   : > { %s2180_s23 = scalar_select %p505_p3, %s1827_s22, 1 }
  0x11   : > { %546 = sbr.rel (%p1839_p4) target bundleno = 24 (0x18), region = 72  ;;  %v547_v0 = vld [vmem:[%s2389_s1] sm:$0xff] (!%p1839_p4)  ;;  %vm549_vm0 = vcmask (!%p1839_p4), 261120   ;;  %v548_v1 = vld [vmem:[%s2389_s1 + $0x8] sm:$0xff] (!%p1839_p4) }
  0x12   : > { %s1869_s24 = sshll.u32 %s2180_s23, 5  ;;  %s523_s21 = scalar_lea.vmem %s2394_s6, %s2180_s23  ;;  %550 = vst.msk [vmem:[#allocation2] sm:$0xff] (!%p1839_p4), %vm549_vm0, %v547_v0  ;;  %551 = vst.msk [vmem:[#allocation2 + $0x8] sm:$0xff] (!%p1839_p4), %vm549_vm0, %v548_v1 }
  0x13   : > { %s509_s30 = scalar_lea.vmem %s2407_s2, %s1869_s24  ;;  %s2193_s15 = scalar_lea.vmem %s2408_s4, %s1869_s24 }
  0x14   : > { %s526_s26 = scalar_lea.vmem %s2395_s7, %s2180_s23  ;;  %s2210_s29 = scalar_lea.vmem %s2396_s8, %s1869_s24 }
  0x15   : > { %s534_s2 = scalar_lea.vmem %s2397_s9, %s2180_s23  ;;  %s1872_s4 = sshll.u32 %s2180_s23, 6 }
  0x16   : > { %s2220_s18 = scalar_lea.vmem %s2398_s10, %s1872_s4  ;;  %s542_s12 = scalar_lea.vmem %s2399_s11, %s2180_s23 }
  0x18 PF: > { %v590_v2 = vld [vmem:[%s509_s30] sm:$0xff]  ;;  %v591_v3 = vld [vmem:[%s509_s30 + $0x8] sm:$0xff]  ;;  %v592_v4 = vld [vmem:[%s509_s30 + $0x10] sm:$0xff]  ;;  %vm601_vm1 = vcmask 261120   ;;  %v2098_v10 = vmov 0.0   ;;  %vm2099_vm2 = vmmov 0   ;;  %v567_v20 = vlaneseq  ;;  %s2410_s28 = scalar_lea.vmem %s2393_s5, %s2180_s23 }
  0x19   : > { %v2009_v5 = vpack.c.bf16 %v591_v3, %v590_v2  ;;  %v593_v6 = vld [vmem:[%s509_s30 + $0x18] sm:$0xff]  ;;  %v2232_v7 = vld [vmem:[#allocation2] sm:$0xff]  ;;  %v2236_v9 = vld [vmem:[#allocation2 + $0x8] sm:$0xff]  ;;  %1938 = vmatprep.subr.mxu0 %v2098_v10  ;;  %1940 = vmatprep.mubr.msk.f32.mxu0 %vm2099_vm2, %v2098_v10  ;;  %s2409_s30 = scalar_lea.vmem %s2391_s3, %s2180_s23  ;;  %s2100_s13 = smov 96   ;;  %vm686_vm3 = vcmask 130048   ;;  %vm842_vm5 = vcmask 64512  }
  0x1a   : > { %v2013_v8 = vpack.c.bf16 %v593_v6, %v592_v4  ;;  %1925 = vmatprep.mubr.msk.f32.mxu1 %vm601_vm1, %v2232_v7  ;;  %v1841_v11 = vld [vmem:[%s2409_s30] ss:$0 sm:$0xff]  ;;  %v2101_v18 = vmov 1966171168   ;;  %v568_v22 = vshrl.u32 %v567_v20, 7  ;;  %s2102_s17 = smov 64  }
  0x1b   : > { %2010 = vmatprep.subr.bf16.mxu1 %v2009_v5  ;;  %v565_v19 = vunpack.c.l.s4 %v2101_v18  ;;  %v1840_v24 = vld.sshfl [vmem:[%s2388_s0] sm:$0x11 pattern:$0x75316420]  ;;  %s2103_s19 = smov 80   ;;  %s2104_s20 = smov 112  }
  0x1c   : > { %2012 = vmatpush3.bf16.msra.mxu1 %v2009_v5  ;;  %v563_v25 = vcombine.high %v1840_v24, %v1840_v24  ;;  %v580_v27 = vsub.s32 0, %v568_v22  ;;  %s2105_s25 = smov 48   ;;  %s2106_s27 = smov 16   ;;  %vm1361_vm7 = vcmask 261248   ;;  %vm1623_vm8 = vcmask 523264  }
  0x1d   : > { %2014 = vmatprep.subr.bf16.mxu1 %v2013_v8  ;;  %v566_v21 = vunpack.c.0.s8 %v565_v19  ;;  %s2411_s16 = sld [smem:[#allocation7_spill]] }
  0x1f   : > { %v569_v23 = vsub.s32 %v566_v21, %v568_v22 }
  0x20   : > { %2016 = vmatpush3.bf16.msra.mxu1 %v2013_v8 }
  0x21   : > { %1928 = vmatprep.subr.mxu1 %v2098_v10  ;;  %v570_v26 = vrot.slane %v1840_v24, %v569_v23  ;;  %v577_v29 = vrot.slane %v563_v25, %v569_v23 }
  0x23   : > { %1926 = vmatmul.mubr.msk.f32.vlgmr.msra.gmra.mrb[0].mxu1 %vm601_vm1, %v2236_v9  ;;  %v2272_v28 = vrot.slane %v570_v26, %v580_v27  ;;  %v2275_v31 = vrot.slane %v577_v29, %v580_v27 }
  0x24   : > { %1930 = vmatprep.mubr.msk.f32.mxu1 %vm2099_vm2, %v2098_v10 }
  0x25   : > { %vm588_vm4 = vcmp.gt.f32.partialorder %v2272_v28, 0.5  ;;  %vm589_vm6 = vcmp.gt.f32.partialorder %v2275_v31, 0.5 }
  0xf6   : > { %v1927_v12 = vpop.f32.mrb[0].mxu1 }
  0xf7   : > { %v674_v13 = vpop.f32.mrb[1].mxu1  ;;  %v2254_v15 = vadd.f32 %v1927_v12, %v1841_v11 }
  0xf8   : > { %v2251_v14 = vadd.f32 %v1841_v11, %v674_v13 }
  0xfa   : > { %684 = vrot.lane.b32.xlu0 %v2251_v14, %s2100_s13 }
  0xfe   : > { %762 = vrot.lane.b32.xlu0 %v2254_v15, %s2100_s13 }
 0x16c   : > { %v685_v16 = vpop.permute.xlu0 %684 }
 0x16d   : > { %1929 = vmatpush3.xpose.msk.msra.mxu1 %vm686_vm3, %v685_v16 }
 0x16e   : > { %1933 = vmatprep.subr.mxu1 %v2098_v10 }
 0x170   : > { %1931 = vmatmul.mubr.msk.f32.vlgmr.msra.gmra.mrb[2].mxu1 %vm686_vm3, %v2251_v14  ;;  %v763_v17 = vpop.permute.xlu0 %762 }
 0x171   : > { %1934 = vmatpush3.xpose.msk.msra.mxu1 %vm686_vm3, %v763_v17  ;;  %1935 = vmatprep.mubr.msk.f32.mxu1 %vm2099_vm2, %v2098_v10 }
 0x172   : > { %1943 = vmatprep.subr.mxu1 %v2098_v10 }
 0x174   : > { %1936 = vmatmul.mubr.msk.f32.vlgmr.msra.gmra.mrb[4].mxu1 %vm686_vm3, %v2254_v15 }
 0x175   : > { %1945 = vmatprep.mubr.msk.f32.mxu1 %vm2099_vm2, %v2098_v10 }
 0x243   : > { %v757_v30 = vpop.f32.mrb[2].mxu1 }
 0x244   : > { %v838_v32 = vmul.f32 0.25, %v757_v30  ;;  %v1932_v33 = vpop.f32.mrb[3].mxu1 }
 0x246   : > { %v840_v34 = vsel %vm588_vm4, 1e-09, %v838_v32 }
 0x247   : > { %v834_v35 = vpop.f32.mrb[4].mxu1  ;;  %v843_v36 = vsel %vm842_vm5, %v840_v34, -inf }
 0x248   : > { %v839_v37 = vmul.f32 0.25, %v834_v35  ;;  %844 = vmax.xlane.f32.xlu1 %v843_v36  ;;  %v1937_v38 = vpop.f32.mrb[5].mxu1  ;;  %v1367_v35 = vld [vmem:[%s2193_s15 + $0x8] sm:$0xff] }
 0x24a   : > { %v841_v39 = vsel %vm589_vm6, 1e-09, %v839_v37  ;;  %v1369_v37 = vld [vmem:[%s2193_s15 + $0x18] sm:$0xff] }
 0x24b   : > { %v846_v40 = vsel %vm842_vm5, %v841_v39, -inf }
 0x24c   : > { %847 = vmax.xlane.f32.xlu1 %v846_v40 }
 0x25d   : > { %865 = vrot.lane.b32.xlu1 %v2251_v14, %s2102_s17 }
 0x261   : > { %941 = vrot.lane.b32.xlu1 %v2254_v15, %s2102_s17 }
 0x265   : > { %1021 = vrot.lane.b32.xlu1 %v2251_v14, %s2103_s19 }
 0x269   : > { %1099 = vrot.lane.b32.xlu1 %v2254_v15, %s2103_s19 }
 0x2d5   : > { %v845_v41 = vpop.xlane.xlu1 %844 }
 0x2d6   : > { %v849_v42 = vsub.f32 %v840_v34, %v845_v41  ;;  %v1366_v34 = vld [vmem:[%s2193_s15] sm:$0xff] }
 0x2d7   : > { %v2017_v36 = vpack.c.bf16 %v1367_v35, %v1366_v34  ;;  %v1614_v34 = vld [vmem:[%s2220_s18 + $0x30] sm:$0xff]  ;;  %v1615_v35 = vld [vmem:[%s2220_s18 + $0x38] sm:$0xff] }
 0x2d8   : > { %v851_v43 = vmul.f32 1.442695, %v849_v42 }
 0x2d9   : > { %v848_v44 = vpop.xlane.xlu1 %847 }
 0x2da   : > { %2066 = vpow2.f32 %v851_v43  ;;  %v850_v45 = vsub.f32 %v841_v39, %v848_v44 }
 0x2dc   : > { %v853_v46 = vmul.f32 1.442695, %v850_v45 }
 0x2dd   : > { %v866_v47 = vpop.permute.xlu1 %865 }
 0x2de   : > { %2068 = vpow2.f32 %v853_v46  ;;  %1939 = vmatpush3.msra.mxu0 %v866_v47  ;;  %v1856_v47 = vld [vmem:[%s2410_s28] ss:$0 sm:$0xff] }
 0x2df   : > { %1948 = vmatprep.subr.mxu0 %v2098_v10 }
 0x2e1   : > { %v942_v48 = vpop.permute.xlu1 %941 }
 0x2e2   : > { %1944 = vmatpush3.msra.mxu1 %v942_v48 }
 0x2e3   : > { %1953 = vmatprep.subr.mxu1 %v2098_v10 }
 0x2e4   : > { %v2067_v49 = vpop.eup %2066 }
 0x2e5   : > { %v855_v50 = vsel %vm842_vm5, %v2067_v49, 0.0  ;;  %v1022_v53 = vpop.permute.xlu1 %1021 }
 0x2e6   : > { %856 = vadd.xlane.f32.xlu0 %v855_v50 }
 0x2e8   : > { %v2069_v51 = vpop.eup %2068 }
 0x2e9   : > { %v858_v52 = vsel %vm842_vm5, %v2069_v51, 0.0  ;;  %v1100_v54 = vpop.permute.xlu1 %1099 }
 0x2ea   : > { %859 = vadd.xlane.f32.xlu1 %v858_v52 }
 0x2fb   : > { %1097 = vrot.lane.b32.xlu1 %v2254_v15, %s2104_s20 }
 0x2fc   : > { %1019 = vrot.lane.b32.xlu0 %v2251_v14, %s2104_s20 }
 0x373   : > { %v857_v55 = vpop.xlane.xlu0 %856 }
 0x374   : > { %2070 = vrcp.f32 %v857_v55 }
 0x377   : > { %v860_v56 = vpop.xlane.xlu1 %859  ;;  %v1020_v61 = vpop.permute.xlu0 %1019 }
 0x378   : > { %2072 = vrcp.f32 %v860_v56 }
 0x37b   : > { %v1098_v62 = vpop.permute.xlu1 %1097 }
 0x37e   : > { %v2071_v57 = vpop.eup %2070 }
 0x37f   : > { %v863_v58 = vmul.f32 %v2071_v57, %v2067_v49 }
 0x381   : > { %1941 = vmatmul.mubr.msk.f32.vlgmr.msra.gmra.mrb[0].mxu0 %vm842_vm5, %v863_v58 }
 0x382   : > { %v2073_v59 = vpop.eup %2072  ;;  %1949 = vmatpush3.xpose.msk.msra.mxu0 %vm686_vm3, %v1022_v53  ;;  %1950 = vmatprep.mubr.msk.f32.mxu0 %vm2099_vm2, %v2098_v10 }
 0x383   : > { %v864_v60 = vmul.f32 %v2073_v59, %v2069_v51  ;;  %1958 = vmatprep.subr.mxu0 %v2098_v10 }
 0x385   : > { %1946 = vmatmul.mubr.msk.f32.vlgmr.msra.gmra.mrb[6].mxu1 %vm842_vm5, %v864_v60  ;;  %1951 = vmatmul.mubr.msk.f32.vlgmr.msra.gmra.mrb[2].mxu0 %vm686_vm3, %v1020_v61 }
 0x386   : > { %1954 = vmatpush3.xpose.msk.msra.mxu1 %vm686_vm3, %v1100_v54  ;;  %1955 = vmatprep.mubr.msk.f32.mxu1 %vm2099_vm2, %v2098_v10 }
 0x387   : > { %1963 = vmatprep.subr.mxu1 %v2098_v10  ;;  %1960 = vmatprep.mubr.msk.f32.mxu0 %vm2099_vm2, %v2098_v10 }
 0x389   : > { %1956 = vmatmul.mubr.msk.f32.vlgmr.msra.gmra.mrb[8].mxu1 %vm686_vm3, %v1098_v62 }
 0x38a   : > { %1965 = vmatprep.mubr.msk.f32.mxu1 %vm2099_vm2, %v2098_v10 }
 0x454   : > { %v937_v63 = vpop.f32.mrb[0].mxu0 }
 0x455   : > { %1017 = vst.msk [vmem:[#allocation3] sm:$0xff] %vm686_vm3, %v937_v63  ;;  %v1942_v0 = vpop.f32.mrb[1].mxu0 }
 0x456   : > { %v1505_v0 = vld [vmem:[%s2210_s29] sm:$0xff] }
 0x458   : > { %v1013_v1 = vpop.f32.mrb[6].mxu1  ;;  %v1093_v2 = vpop.f32.mrb[2].mxu0 }
 0x459   : > { %1018 = vst.msk [vmem:[#allocation3 + $0x8] sm:$0xff] %vm686_vm3, %v1013_v1  ;;  %v1175_v3 = vmul.f32 0.25, %v1093_v2  ;;  %v1947_v4 = vpop.f32.mrb[7].mxu1  ;;  %v1952_v5 = vpop.f32.mrb[3].mxu0  ;;  %v1506_v1 = vld [vmem:[%s2210_s29 + $0x8] sm:$0xff] }
 0x45a   : > { %v2025_v2 = vpack.c.bf16 %v1506_v1, %v1505_v0  ;;  %v1508_v4 = vld [vmem:[%s2210_s29 + $0x18] sm:$0xff] }
 0x45b   : > { %v1177_v6 = vsel %vm588_vm4, 1e-09, %v1175_v3  ;;  %v1507_v3 = vld [vmem:[%s2210_s29 + $0x10] sm:$0xff] }
 0x45c   : > { %v1171_v8 = vpop.f32.mrb[8].mxu1  ;;  %v1179_v11 = vsel %vm842_vm5, %v1177_v6, -inf  ;;  %v2029_v5 = vpack.c.bf16 %v1508_v4, %v1507_v3 }
 0x45d   : > { %v1176_v12 = vmul.f32 0.25, %v1171_v8  ;;  %v1957_v13 = vpop.f32.mrb[9].mxu1  ;;  %1180 = vmax.xlane.f32.xlu1 %v1179_v11 }
 0x45f   : > { %v1178_v10 = vsel %vm589_vm6, 1e-09, %v1176_v12 }
 0x460   : > { %v1182_v16 = vsel %vm842_vm5, %v1178_v10, -inf }
 0x461   : > { %1183 = vmax.xlane.f32.xlu0 %v1182_v16 }
 0x477   : > { %1277 = vrot.lane.b32.xlu0 %v2254_v15, %s2105_s25 }
 0x4ea   : > { %v1181_v17 = vpop.xlane.xlu1 %1180 }
 0x4eb   : > { %v1185_v18 = vsub.f32 %v1177_v6, %v1181_v17  ;;  %v1859_v17 = vld [vmem:[%s523_s21] ss:$0 sm:$0xff] }
 0x4ed   : > { %v1187_v19 = vmul.f32 1.442695, %v1185_v18 }
 0x4ee   : > { %v1184_v20 = vpop.xlane.xlu0 %1183 }
 0x4ef   : > { %2074 = vpow2.f32 %v1187_v19  ;;  %v1186_v21 = vsub.f32 %v1178_v10, %v1184_v20  ;;  %v1860_v19 = vld [vmem:[%s526_s26] ss:$0 sm:$0xff] }
 0x4f1   : > { %v1189_v22 = vmul.f32 1.442695, %v1186_v21 }
 0x4f2   : > { %v1278_v23 = vpop.permute.xlu0 %1277 }
 0x4f3   : > { %2076 = vpow2.f32 %v1189_v22  ;;  %1964 = vmatpush3.msra.mxu1 %v1278_v23 }
 0x4f4   : > { %2026 = vmatprep.subr.bf16.mxu1 %v2025_v2 }
 0x4f9   : > { %v2075_v24 = vpop.eup %2074 }
 0x4fa   : > { %v1191_v25 = vsel %vm842_vm5, %v2075_v24, 0.0 }
 0x4fb   : > { %1192 = vadd.xlane.f32.xlu1 %v1191_v25 }
 0x4fd   : > { %v2077_v26 = vpop.eup %2076 }
 0x4fe   : > { %v1194_v27 = vsel %vm842_vm5, %v2077_v26, 0.0 }
 0x4ff   : > { %1195 = vadd.xlane.f32.xlu1 %v1194_v27  ;;  %v1609_v27 = vld [vmem:[%s2220_s18 + $0x8] sm:$0xff] }
 0x510   : > { %1201 = vrot.lane.b32.xlu1 %v2251_v14, %s2105_s25  ;;  %v1368_v14 = vld [vmem:[%s2193_s15 + $0x10] sm:$0xff] }
 0x511   : > { %v2021_v38 = vpack.c.bf16 %v1369_v37, %v1368_v14  ;;  %v1861_v14 = vld [vmem:[%s534_s2] ss:$0 sm:$0xff] }
 0x588   : > { %v1193_v15 = vpop.xlane.xlu1 %1192 }
 0x589   : > { %2078 = vrcp.f32 %v1193_v15 }
 0x58c   : > { %v1196_v28 = vpop.xlane.xlu1 %1195 }
 0x58d   : > { %2080 = vrcp.f32 %v1196_v28  ;;  %v1610_v28 = vld [vmem:[%s2220_s18 + $0x10] sm:$0xff] }
 0x590   : > { %v1202_v29 = vpop.permute.xlu1 %1201 }
 0x591   : > { %1959 = vmatpush3.msra.mxu0 %v1202_v29  ;;  %v1611_v29 = vld [vmem:[%s2220_s18 + $0x18] sm:$0xff] }
 0x592   : > { %2018 = vmatprep.subr.bf16.mxu0 %v2017_v36 }
 0x593   : > { %v2079_v30 = vpop.eup %2078 }
 0x594   : > { %v1199_v31 = vmul.f32 %v2079_v30, %v2075_v24  ;;  %v2037_v30 = vpack.c.bf16 %v1611_v29, %v1610_v28 }
 0x596   : > { %1961 = vmatmul.mubr.msk.f32.vlgmr.msra.gmra.mrb[4].mxu0 %vm842_vm5, %v1199_v31  ;;  %v1612_v31 = vld [vmem:[%s2220_s18 + $0x20] sm:$0xff] }
 0x597   : > { %v2081_v32 = vpop.eup %2080  ;;  %2020 = vmatpush3.bf16.msra.mxu0 %v2017_v36  ;;  %v2045_v36 = vpack.c.bf16 %v1615_v35, %v1614_v34 }
 0x598   : > { %v1200_v33 = vmul.f32 %v2081_v32, %v2077_v26  ;;  %2022 = vmatprep.subr.bf16.mxu0 %v2021_v38  ;;  %v1608_v26 = vld [vmem:[%s2220_s18] sm:$0xff]  ;;  %v1613_v32 = vld [vmem:[%s2220_s18 + $0x28] sm:$0xff] }
 0x599   : > { %v2033_v15 = vpack.c.bf16 %v1609_v27, %v1608_v26 }
 0x59a   : > { %1966 = vmatmul.mubr.msk.f32.vlgmr.msra.gmra.mrb[10].mxu1 %vm842_vm5, %v1200_v33  ;;  %v2041_v33 = vpack.c.bf16 %v1613_v32, %v1612_v31 }
 0x59b   : > { %2024 = vmatpush3.bf16.msra.mxu0 %v2021_v38  ;;  %2028 = vmatpush3.bf16.msra.mxu1 %v2025_v2 }
 0x59c   : > { %2030 = vmatprep.subr.bf16.mxu1 %v2029_v5  ;;  %2034 = vmatprep.subr.bf16.mxu0 %v2033_v15 }
 0x59f   : > { %2032 = vmatpush3.bf16.msra.mxu1 %v2029_v5 }
 0x669   : > { %v1273_v39 = vpop.f32.mrb[4].mxu0 }
 0x66a   : > { %1355 = vrot.lane.b32.xlu1 %v1273_v39, %s2106_s27  ;;  %v1962_v40 = vpop.f32.mrb[5].mxu0 }
 0x66d   : > { %v1349_v41 = vpop.f32.mrb[10].mxu1 }
 0x66e   : > { %1357 = vrot.lane.b32.xlu1 %v1349_v41, %s2106_s27  ;;  %v1967_v42 = vpop.f32.mrb[11].mxu1 }
 0x6dc   : > { %v1356_v43 = vpop.permute.xlu1 %1355 }
 0x6dd   : > { %1362 = vst.msk [vmem:[#allocation3] sm:$0xff] %vm1361_vm7, %v1356_v43 }
 0x6e0   : > { %v1358_v44 = vpop.permute.xlu1 %1357 }
 0x6e1   : > { %1363 = vst.msk [vmem:[#allocation3 + $0x8] sm:$0xff] %vm1361_vm7, %v1358_v44 }
 0x6e4   : > { %v1364_v45 = vld [vmem:[#allocation3] sm:$0xff] }
 0x6e5   : > { %1976 = vmatprep.mubr.msk.f32.mxu0 %vm601_vm1, %v1364_v45 }
 0x6e8   : > { %v1365_v46 = vld [vmem:[#allocation3 + $0x8] sm:$0xff] }
 0x6e9   : > { %1977 = vmatmul.mubr.msk.f32.vlgmr.msra.gmra.mrb[6].mxu0 %vm601_vm1, %v1365_v46 }
 0x6ea   : > { %2036 = vmatpush3.bf16.msra.mxu0 %v2033_v15 }
 0x6eb   : > { %2038 = vmatprep.subr.bf16.mxu0 %v2037_v30 }
 0x6ee   : > { %2040 = vmatpush3.bf16.msra.mxu0 %v2037_v30 }
 0x6ef   : > { %2042 = vmatprep.subr.bf16.mxu0 %v2041_v33 }
 0x6f2   : > { %2044 = vmatpush3.bf16.msra.mxu0 %v2041_v33 }
 0x6f3   : > { %2046 = vmatprep.subr.bf16.mxu0 %v2045_v36 }
 0x6f6   : > { %2048 = vmatpush3.bf16.msra.mxu0 %v2045_v36 }
 0x7bc   : > { %v1978_v48 = vpop.f32.mrb[6].mxu0 }
 0x7bd   : > { %v1455_v49 = vadd.f32 %v1978_v48, %v1856_v47  ;;  %v1449_v50 = vpop.f32.mrb[7].mxu0 }
 0x7be   : > { %v1450_v51 = vadd.f32 %v1856_v47, %v1449_v50 }
 0x7bf   : > { %v1459_v52 = vadd.f32 %v1455_v49, %v2236_v9 }
 0x7c0   : > { %v1458_v53 = vadd.f32 %v1450_v51, %v2232_v7  ;;  %v1864_v51 = vld [vmem:[%s542_s12] ss:$0 sm:$0xff] }
 0x7c1   : > { %v1463_v54 = vsel %vm601_vm1, %v1459_v52, 0.0 }
 0x7c2   : > { %1464 = vadd.xlane.f32.xlu1 %v1463_v54  ;;  %v1460_v55 = vsel %vm601_vm1, %v1458_v53, 0.0 }
 0x7c3   : > { %1461 = vadd.xlane.f32.xlu0 %v1460_v55 }
 0x84f   : > { %v1465_v56 = vpop.xlane.xlu1 %1464 }
 0x850   : > { %v1468_v57 = vmul.f32 0.03125, %v1465_v56  ;;  %v1462_v58 = vpop.xlane.xlu0 %1461 }
 0x851   : > { %v1467_v59 = vmul.f32 0.03125, %v1462_v58 }
 0x852   : > { %v1470_v60 = vsub.f32 %v1459_v52, %v1468_v57 }
 0x853   : > { %v1469_v61 = vsub.f32 %v1458_v53, %v1467_v59 }
 0x854   : > { %v1472_v7 = vmul.f32 %v1470_v60, %v1470_v60 }
 0x855   : > { %v1471_v62 = vmul.f32 %v1469_v61, %v1469_v61 }
 0x856   : > { %v1476_v63 = vsel %vm601_vm1, %v1472_v7, 0.0 }
 0x857   : > { %v1473_v9 = vsel %vm601_vm1, %v1471_v62, 0.0 }
 0x858   : > { %1474 = vadd.xlane.f32.xlu0 %v1473_v9 }
 0x85c   : > { %1477 = vadd.xlane.f32.xlu0 %v1476_v63 }
 0x8e5   : > { %v1475_v6 = vpop.xlane.xlu0 %1474 }
 0x8e6   : > { %v1479_v8 = vmul.f32 0.03125, %v1475_v6 }
 0x8e8   : > { %v1481_v11 = vadd.f32 1e-05, %v1479_v8 }
 0x8e9   : > { %v1478_v12 = vpop.xlane.xlu0 %1477 }
 0x8ea   : > { %2082 = vrsqrt.f32 %v1481_v11  ;;  %v1480_v13 = vmul.f32 0.03125, %v1478_v12 }
 0x8ec   : > { %v1482_v10 = vadd.f32 1e-05, %v1480_v13 }
 0x8ee   : > { %2084 = vrsqrt.f32 %v1482_v10 }
 0x8f4   : > { %v2083_v16 = vpop.eup %2082 }
 0x8f5   : > { %v1485_v18 = vmul.f32 %v2083_v16, %v1469_v61 }
 0x8f7   : > { %v1494_v20 = vmul.f32 %v1859_v17, %v1485_v18 }
 0x8f8   : > { %v2085_v21 = vpop.eup %2084 }
 0x8f9   : > { %v1486_v22 = vmul.f32 %v2085_v21, %v1470_v60  ;;  %v1503_v23 = vadd.f32 %v1860_v19, %v1494_v20 }
 0x8fb   : > { %v1495_v24 = vmul.f32 %v1859_v17, %v1486_v22  ;;  %1987 = vmatprep.mubr.msk.f32.mxu1 %vm601_vm1, %v1503_v23 }
 0x8fd   : > { %v1504_v25 = vadd.f32 %v1860_v19, %v1495_v24 }
 0x8ff   : > { %1988 = vmatmul.mubr.msk.f32.vlgmr.msra.gmra.mrb[12].mxu1 %vm601_vm1, %v1504_v25 }
 0x9d2   : > { %v1989_v37 = vpop.f32.mrb[12].mxu1 }
 0x9d3   : > { %v1594_v38 = vadd.f32 %v1989_v37, %v1861_v14  ;;  %v1588_v39 = vpop.f32.mrb[13].mxu1 }
 0x9d4   : > { %v1589_v40 = vadd.f32 %v1861_v14, %v1588_v39 }
 0x9d5   : > { %v1601_v41 = vmul.f32 0.70710677, %v1594_v38  ;;  %v1598_v48 = vmul.f32 0.5, %v1594_v38 }
 0x9d6   : > { %v1600_v42 = vmul.f32 0.70710677, %v1589_v40  ;;  %v1597_v46 = vmul.f32 0.5, %v1589_v40 }
 0x9d7   : > { %2086 = verf.f32 %v1601_v41 }
 0x9d8   : > { %2088 = verf.f32 %v1600_v42 }
 0x9e1   : > { %v2087_v43 = vpop.eup %2086 }
 0x9e2   : > { %v2089_v44 = vpop.eup %2088  ;;  %v1605_v45 = vadd.f32 1.0, %v2087_v43 }
 0x9e3   : > { %v1604_v47 = vadd.f32 1.0, %v2089_v44 }
 0x9e4   : > { %v1607_v50 = vmul.f32 %v1605_v45, %v1598_v48 }
 0x9e5   : > { %v1606_v49 = vmul.f32 %v1604_v47, %v1597_v46 }
 0x9e7   : > { %2006 = vmatprep.mubr.msk.f32.mxu0 %vm1623_vm8, %v1606_v49 }
 0x9e8   : > { %2007 = vmatmul.mubr.msk.f32.vlgmr.msra.gmra.mrb[8].mxu0 %vm1623_vm8, %v1607_v50 }
 0xabb   : > { %v2008_v52 = vpop.f32.mrb[8].mxu0 }
 0xabc   : > { %v1702_v53 = vadd.f32 %v2008_v52, %v1864_v51  ;;  %v1696_v54 = vpop.f32.mrb[9].mxu0 }
 0xabd   : > { %v1697_v55 = vadd.f32 %v1864_v51, %v1696_v54 }
 0xabe   : > { %1706 = vst.msk [vmem:[#allocation2 + $0x8] sm:$0xff] %vm601_vm1, %v1702_v53  ;;  %1708 = vst.msk [vmem:[%s2411_s16 + $0x8] sm:$0xff] %vm601_vm1, %v1702_v53 }
 0xabf   : > { %1705 = vst.msk [vmem:[#allocation2] sm:$0xff] %vm601_vm1, %v1697_v55  ;;  %1707 = vst.msk [vmem:[%s2411_s16] sm:$0xff] %vm601_vm1, %v1697_v55 }
 0xac0 PF: > { %s2412_s23 = sld [smem:[#allocation4_spill]] }
 0xac6   : > { %s22_s21 = sadd.s32 1, %s2412_s23  }
 0xac7   : > { %p19_p5 = scmp.ge.s32.totalorder %s22_s21, 4  }
 0xac9   :  { %21 = sbr.rel (!%p19_p5) target bundleno = 4 (0x4), region = 125 }

</bundles_post_ra>
